<compile_context>
chip_gen: v7x
topology: tpu7x:2x2x1
jax: 0.10.0
libtpu: 0.0.40
codegen_flags: <defaults>
</compile_context>

<pallas_src>
import functools

import jax
import jax.numpy as jnp
from jax.experimental import pallas as pl
from jax.experimental.pallas import tpu as pltpu


def _round_up(x: int, m: int) -> int:
    return ((x + m - 1) // m) * m


def _sep_mlp_kernel(x_ref, w1_ref, b1_ref, w2_ref, b2_ref, o_ref):
    # x_ref : (1, TM, D)      tile of rows for feature f
    # w1_ref: (1, D, Hp)      first linear weight (feature f)
    # b1_ref: (1, 1, Hp)      first linear bias
    # w2_ref: (1, Hp, Cp)     second linear weight
    # b2_ref: (1, 1, Cp)      second linear bias
    # o_ref : (1, TM, Cp)
    x = x_ref[0]                                               # (TM, D)

    # Linear 1 (MXU, f32 accumulation) + bias + ReLU
    h = jnp.dot(x, w1_ref[0], preferred_element_type=jnp.float32)
    h = jnp.maximum(h + b1_ref[0].astype(jnp.float32), 0.0)

    # Linear 2 (MXU, f32 accumulation) + bias
    out = jnp.dot(h.astype(w2_ref.dtype), w2_ref[0],
                  preferred_element_type=jnp.float32)
    out = out + b2_ref[0].astype(jnp.float32)

    o_ref[0] = out.astype(o_ref.dtype)


def sep_mlp(x, w1s, b1s, w2s, b2s, *, tile_rows=256):
    """x: (B, F, D). Per-feature params:
         w1s[i]: (D, H), b1s[i]: (H,), w2s[i]: (H, cat_i), b2s[i]: (cat_i,)
       Returns a list of F arrays, out[i]: (B, cat_i)."""
    B, F, D = x.shape
    H = w1s[0].shape[1]
    cats = [int(w.shape[1]) for w in w2s]
    dtype = x.dtype

    # Lane-dense padding of hidden and output widths (exact: zero pad weights).
    Hp = _round_up(H, 128)
    Cp = _round_up(max(cats), 128)

    # Row tiling: big default tile, padded batch instead of divisibility assert.
    TM = max(8, (min(tile_rows, _round_up(B, 8)) // 8) * 8)
    Bp = _round_up(B, TM)

    # Pack per-feature parameters into stacked, zero-padded tensors (setup cost,
    # done once per call; in a real model these would be pre-packed).
    w1 = jnp.zeros((F, D, Hp), dtype)
    b1 = jnp.zeros((F, 1, Hp), dtype)
    w2 = jnp.zeros((F, Hp, Cp), dtype)
    b2 = jnp.zeros((F, 1, Cp), dtype)
    for i in range(F):
        w1 = w1.at[i, :, :H].set(w1s[i])
        b1 = b1.at[i, 0, :H].set(b1s[i])
        w2 = w2.at[i, :H, :cats[i]].set(w2s[i])
        b2 = b2.at[i, 0, :cats[i]].set(b2s[i])

    # (F, B, D) with batch padded to a multiple of TM.
    xt = jnp.transpose(x, (1, 0, 2))
    if Bp != B:
        xt = jnp.pad(xt, ((0, 0), (0, Bp - B), (0, 0)))

    grid = (F, Bp // TM)

    out = pl.pallas_call(
        _sep_mlp_kernel,
        out_shape=jax.ShapeDtypeStruct((F, Bp, Cp), dtype),
        grid_spec=pltpu.PrefetchScalarGridSpec(
            num_scalar_prefetch=0,
            grid=grid,
            in_specs=[
                pl.BlockSpec((1, TM, D), lambda f, r: (f, r, 0)),   # x rows
                pl.BlockSpec((1, D, Hp), lambda f, r: (f, 0, 0)),   # W1[f]
                pl.BlockSpec((1, 1, Hp), lambda f, r: (f, 0, 0)),   # b1[f]
                pl.BlockSpec((1, Hp, Cp), lambda f, r: (f, 0, 0)),  # W2[f]
                pl.BlockSpec((1, 1, Cp), lambda f, r: (f, 0, 0)),   # b2[f]
            ],
            out_specs=pl.BlockSpec((1, TM, Cp), lambda f, r: (f, r, 0)),
        ),
        compiler_params=pltpu.CompilerParams(
            dimension_semantics=("parallel", "parallel")),
    )(xt, w1, b1, w2, b2)

    # Un-pad: list of per-feature predictions, matching PyTorch's list output.
    return [out[i, :B, :cats[i]] for i in range(F)]


def sep_mlp_ref(x, w1s, b1s, w2s, b2s):
    outs = []
    for i in range(x.shape[1]):
        xi = x[:, i, :].astype(jnp.float32)
        h = jnp.maximum(xi @ w1s[i].astype(jnp.float32) + b1s[i], 0.0)
        outs.append((h @ w2s[i].astype(jnp.float32) + b2s[i]).astype(x.dtype))
    return outs


if __name__ == "__main__":
    # Small shapes consistent with the module:
    #   batch B=4, len_feats=3, dim=8 -> hidden=5*dim=40, categories=[2, 3, 5]
    B, F, D = 4, 3, 8
    H = 5 * D
    categories = [2, 3, 5]

    key = jax.random.PRNGKey(0)
    kx, *kp = jax.random.split(key, 1 + 4 * F)

    x = jax.random.normal(kx, (B, F, D), dtype=jnp.float32)

    # Deterministic per-feature simple_MLP params (kaiming-uniform-ish scale,
    # matching PyTorch nn.Linear default init bounds).
    w1s, b1s, w2s, b2s = [], [], [], []
    for i in range(F):
        k1, k2, k3, k4 = kp[4 * i: 4 * i + 4]
        bound1 = 1.0 / (D ** 0.5)
        bound2 = 1.0 / (H ** 0.5)
        w1s.append(jax.random.uniform(k1, (D, H), jnp.float32, -bound1, bound1))
        b1s.append(jax.random.uniform(k2, (H,), jnp.float32, -bound1, bound1))
        w2s.append(jax.random.uniform(k3, (H, categories[i]), jnp.float32,
                                      -bound2, bound2))
        b2s.append(jax.random.uniform(k4, (categories[i],), jnp.float32,
                                      -bound2, bound2))

    outs = sep_mlp(x, w1s, b1s, w2s, b2s)
    outs = jax.block_until_ready(outs)

    refs = sep_mlp_ref(x, w1s, b1s, w2s, b2s)
    assert len(outs) == F
    for i in range(F):
        assert outs[i].shape == (B, categories[i])
        assert jnp.allclose(outs[i], refs[i], atol=1e-5, rtol=1e-5), (
            f"mismatch vs reference at feature {i}")

    print("KERNEL_OK")
</pallas_src>

<mosaic_0001>
module attributes {stable_mosaic.version = 11 : i64} {
  func.func @_sep_mlp_kernel(%arg0: i32, %arg1: i32, %arg2: memref<1x8x8xf32, #tpu.memory_space<vmem>>, %arg3: memref<1x8x128xf32, #tpu.memory_space<vmem>>, %arg4: memref<1x1x128xf32, #tpu.memory_space<vmem>>, %arg5: memref<1x128x128xf32, #tpu.memory_space<vmem>>, %arg6: memref<1x1x128xf32, #tpu.memory_space<vmem>>, %arg7: memref<1x8x128xf32, #tpu.memory_space<vmem>>) attributes {dimension_semantics = [#tpu.dimension_semantics<parallel>, #tpu.dimension_semantics<parallel>], iteration_bounds = array<i64: 3, 1>, scalar_prefetch = 0 : i64, scratch_operands = 0 : i64, tpu.core_type = #tpu.core_type<tc>, window_params = [{transform_indices = @transform_0, window_bounds = array<i64: 1, 8, 8>}, {transform_indices = @transform_1, window_bounds = array<i64: 1, 8, 128>}, {transform_indices = @transform_2, window_bounds = array<i64: 1, 1, 128>}, {transform_indices = @transform_3, window_bounds = array<i64: 1, 128, 128>}, {transform_indices = @transform_4, window_bounds = array<i64: 1, 1, 128>}, {transform_indices = @transform_5, window_bounds = array<i64: 1, 8, 128>}]} {
    %c0 = arith.constant 0 : index
    %c0_0 = arith.constant 0 : index
    %c0_1 = arith.constant 0 : index
    %0 = vector.load %arg2[%c0, %c0_0, %c0_1] : memref<1x8x8xf32, #tpu.memory_space<vmem>>, vector<1x8x8xf32>
    %1 = vector.shape_cast %0 : vector<1x8x8xf32> to vector<8x8xf32>
    %c0_2 = arith.constant 0 : index
    %c0_3 = arith.constant 0 : index
    %c0_4 = arith.constant 0 : index
    %2 = vector.load %arg3[%c0_2, %c0_3, %c0_4] : memref<1x8x128xf32, #tpu.memory_space<vmem>>, vector<1x8x128xf32>
    %3 = vector.shape_cast %2 : vector<1x8x128xf32> to vector<8x128xf32>
    %cst = arith.constant dense<0.000000e+00> : vector<8x128xf32>
    %4 = tpu.matmul %1, %3, %cst {dimension_numbers = #tpu.dot_dimension_numbers<[1], [0], [0], [1], [0, 0, 1, 1], [], []>} : vector<8x8xf32>, vector<8x128xf32>, vector<8x128xf32> -> vector<8x128xf32>
    %c0_5 = arith.constant 0 : index
    %c0_6 = arith.constant 0 : index
    %c0_7 = arith.constant 0 : index
    %5 = vector.load %arg4[%c0_5, %c0_6, %c0_7] : memref<1x1x128xf32, #tpu.memory_space<vmem>>, vector<1x1x128xf32>
    %6 = vector.shape_cast %5 : vector<1x1x128xf32> to vector<1x128xf32>
    %7 = vector.broadcast %6 : vector<1x128xf32> to vector<8x128xf32>
    %8 = arith.addf %4, %7 : vector<8x128xf32>
    %cst_8 = arith.constant 0.000000e+00 : f32
    %9 = vector.broadcast %cst_8 : f32 to vector<8x128xf32>
    %10 = arith.maximumf %8, %9 : vector<8x128xf32>
    %c0_9 = arith.constant 0 : index
    %c0_10 = arith.constant 0 : index
    %c0_11 = arith.constant 0 : index
    %11 = vector.load %arg5[%c0_9, %c0_10, %c0_11] : memref<1x128x128xf32, #tpu.memory_space<vmem>>, vector<1x128x128xf32>
    %12 = vector.shape_cast %11 : vector<1x128x128xf32> to vector<128x128xf32>
    %cst_12 = arith.constant dense<0.000000e+00> : vector<8x128xf32>
    %13 = tpu.matmul %10, %12, %cst_12 {dimension_numbers = #tpu.dot_dimension_numbers<[1], [0], [0], [1], [0, 0, 1, 1], [], []>} : vector<8x128xf32>, vector<128x128xf32>, vector<8x128xf32> -> vector<8x128xf32>
    %c0_13 = arith.constant 0 : index
    %c0_14 = arith.constant 0 : index
    %c0_15 = arith.constant 0 : index
    %14 = vector.load %arg6[%c0_13, %c0_14, %c0_15] : memref<1x1x128xf32, #tpu.memory_space<vmem>>, vector<1x1x128xf32>
    %15 = vector.shape_cast %14 : vector<1x1x128xf32> to vector<1x128xf32>
    %16 = vector.broadcast %15 : vector<1x128xf32> to vector<8x128xf32>
    %17 = arith.addf %13, %16 : vector<8x128xf32>
    %c0_16 = arith.constant 0 : index
    %c0_17 = arith.constant 0 : index
    %c0_18 = arith.constant 0 : index
    %18 = vector.load %arg7[%c0_16, %c0_17, %c0_18] : memref<1x8x128xf32, #tpu.memory_space<vmem>>, vector<1x8x128xf32>
    %19 = vector.shape_cast %18 : vector<1x8x128xf32> to vector<8x128xf32>
    %20 = vector.shape_cast %17 : vector<8x128xf32> to vector<1x8x128xf32>
    tpu.vector_store %arg7[%c0_16, %c0_17, %c0_18], %20 {strides = array<i32>} : memref<1x8x128xf32, #tpu.memory_space<vmem>>, vector<1x8x128xf32>,
    return
  }
  func.func @transform_0(%arg0: i32, %arg1: i32) -> (i32, i32, i32) {
    %c0_i32 = arith.constant 0 : i32
    %c0_i32_0 = arith.constant 0 : i32
    return %arg0, %arg1, %c0_i32 : i32, i32, i32
  }
  func.func @transform_1(%arg0: i32, %arg1: i32) -> (i32, i32, i32) {
    %c0_i32 = arith.constant 0 : i32
    %c0_i32_0 = arith.constant 0 : i32
    %c0_i32_1 = arith.constant 0 : i32
    return %arg0, %c0_i32, %c0_i32_0 : i32, i32, i32
  }
  func.func @transform_2(%arg0: i32, %arg1: i32) -> (i32, i32, i32) {
    %c0_i32 = arith.constant 0 : i32
    %c0_i32_0 = arith.constant 0 : i32
    %c0_i32_1 = arith.constant 0 : i32
    return %arg0, %c0_i32, %c0_i32_0 : i32, i32, i32
  }
  func.func @transform_3(%arg0: i32, %arg1: i32) -> (i32, i32, i32) {
    %c0_i32 = arith.constant 0 : i32
    %c0_i32_0 = arith.constant 0 : i32
    %c0_i32_1 = arith.constant 0 : i32
    return %arg0, %c0_i32, %c0_i32_0 : i32, i32, i32
  }
  func.func @transform_4(%arg0: i32, %arg1: i32) -> (i32, i32, i32) {
    %c0_i32 = arith.constant 0 : i32
    %c0_i32_0 = arith.constant 0 : i32
    %c0_i32_1 = arith.constant 0 : i32
    return %arg0, %c0_i32, %c0_i32_0 : i32, i32, i32
  }
  func.func @transform_5(%arg0: i32, %arg1: i32) -> (i32, i32, i32) {
    %c0_i32 = arith.constant 0 : i32
    %c0_i32_0 = arith.constant 0 : i32
    return %arg0, %arg1, %c0_i32 : i32, i32, i32
  }
}

</mosaic_0001>

<bundles_post_ra>
// kernel: tpu_custom_call.1
= control target key start
LH: loop header
LB: loop body
LE: loop exit
PB: predicated region body
PF: predicated region fallthrough
CT: control target
= control target key end

     0   :  { %s1386_s0 = inlined_call_operand.hbm [shape: f32[3,8,8], index: 0, kind: input, shape index: {}]   ;;  %s1387_s1 = inlined_call_operand.hbm [shape: f32[3,8,128], index: 1, kind: input, shape index: {}]   ;;  %s1388_s2 = inlined_call_operand.vmem [shape: f32[3,1,128], index: 2, kind: input, shape index: {}]   ;;  %s1389_s3 = inlined_call_operand.hbm [shape: f32[3,128,128], index: 3, kind: input, shape index: {}]   ;;  %s1390_s4 = inlined_call_operand.vmem [shape: f32[3,1,128], index: 4, kind: input, shape index: {}]   ;;  %s1391_s5 = inlined_call_operand.hbm [shape: f32[3,8,128], index: 5, kind: output, shape index: {}]  }
   0x1   :  { %1400 = sst [smem:[#allocation17_spill]] %s1387_s1 }
   0x2   :  { %10 = vsyncpa [#allocation3], 0 }
   0x3   :  { %12 = vsyncpa [#allocation3 + $0x1], 0 }
   0x4   :  { %13 = vsyncpa [#allocation6], 0 }
   0x5   :  { %15 = vsyncpa [#allocation6 + $0x1], 0 }
   0x6   :  { %16 = vsyncpa [#allocation4], 0 }
   0x7   :  { %18 = vsyncpa [#allocation4 + $0x1], 0  ;;  %s1094_s18 = smov 0   ;;  %s1096_s19 = smov 0  }
   0x8   :  { %s1098_s20 = smov 0   ;;  %s1100_s21 = smov 0  }
   0x9   :  { %s1102_s22 = smov 0   ;;  %s1104_s23 = smov 0  }
   0xa LB: > { %1401 = sst [smem:[#allocation12_spill]] %s1033_s18  ;;  %s1125_s24 = sadd.s32 4294967295, %s1053_s23   ;;  %s1053_s23 = sphi %s1104_s23, %s24_s23   ;;  %s1049_s22 = sphi %s1102_s22, %s1428_s22   ;;  %s1045_s21 = sphi %s1100_s21, %s1427_s21   ;;  %s1041_s20 = sphi %s1098_s20, %s1423_s20   ;;  %s1037_s19 = sphi %s1096_s19, %s1426_s19   ;;  %s1033_s18 = sphi %s1094_s18, %s1425_s18  }
   0xb   : > { %1402 = sst [smem:[#allocation13_spill]] %s1041_s20  ;;  %s694_s25 = sadd.s32 4294967294, %s1053_s23  }
   0xc   : > { %s36_s26 = sadd.s32 1, %s1049_s22  ;;  %s45_s27 = sadd.s32 1, %s1041_s20 }
   0xd   : > { %p38_p0 = scmp.ge.s32.totalorder %s36_s26, 3  ;;  %p52_p1 = scmp.ne.s32.totalorder %s1041_s20, %s1037_s19 }
   0xe   : > { %p53_p2 = scmp.eq.s32.totalorder %s1053_s23, 0  ;;  %p58_p3 = scmp.ne.s32.totalorder %s1037_s19, %s1033_s18 }
   0xf   : > { %s1430_s26 = smov (%p38_p0, %s36_s26), 0  ;;  %p59_p5 = scmp.eq.s32.totalorder %s1125_s24, 0 }
  0x10   : > { %1403 = sst [smem:[#allocation14_spill]] %s1430_s26  ;;  %p1137_p4 = por %p53_p2, %p52_p1 }
  0x11   : > { %s40_s29 = ssub.s32 %s1049_s22, %s1430_s26  ;;  %p188_p6 = scmp.eq.s32.totalorder %s1125_s24, 2 }
  0x12   : > { %p43_p7 = scmp.eq.s32.totalorder %s40_s29, 0  ;;  %p1145_p8 = por %p59_p5, %p58_p3 }
  0x13   : > { %p1149_p9 = por %p188_p6, %p52_p1  ;;  %p194_p10 = scmp.eq.s32.totalorder %s694_s25, 2 }
  0x14   : > { %s1405_s30 = scalar_select %p1145_p8, 1, 0 }
  0x15   : > { %s1406_s6 = scalar_select %p1149_p9, 1, 0 }
  0x16   : > { %s1154_s7 = scalar_select %p43_p7, %s1041_s20, %s45_s27  }
  0x17   : > { %p1156_p11 = por %p194_p10, %p58_p3  ;;  %p822_p12 = scmp.lt.s32.totalorder %s1053_s23, 3 }
  0x18   : > { %1407 = sst [smem:[#allocation15_spill]] %s1154_s7  ;;  %s1162_s9 = sand.u32 1, %s1041_s20  }
  0x19   : > { %s1408_s8 = scalar_select %p1156_p11, 1, 0 }
  0x1a   : > { %s1393_s10 = sshll.u32 %s1162_s9, 3  ;;  %s1394_s11 = sshll.u32 %s1049_s22, 7 }
  0x1b   : > { %1409 = sst [smem:[#allocation16_spill]] %s1408_s8  ;;  %p1168_p13 = pnand %p822_p12, %p1137_p4 }
  0x1c   : > { %s233_s13 = sand.u32 1, %s1053_s23   ;;  %s1411_s1 = sld [smem:[#allocation17_spill]] }
  0x1d   : > { %s237_s17 = scalar_lea.vmem [#allocation5], %s1393_s10  ;;  %s701_s27 = sshll.u32 %s1162_s9, 7 }
  0x1e   : > { %s244_s25 = sshll.u32 %s237_s17, 4  ;;  %s1185_s28 = scalar_lea.sflag [#allocation6], %s233_s13  ;;  %s1183_s25 = int_to_ptr.vmem [resolvable:$true] %s244_s25 }
  0x1f   : > { %p1191_p1 = pneg %p1168_p13 }
  0x22   : > { %s1178_s16 = scalar_lea.hbm %s1411_s1, %s1394_s11  ;;  %s882_s17 = scalar_lea.hbm %s1411_s1, 384 }
  0x23   : > { %s877_s29 = scalar_lea.hbm %s1178_s16, 128  ;;  %p883_p4 = scmp.lt.u32.totalorder %s1178_s16, %s1411_s1 }
  0x24   : > { %p878_p0 = scmp.ne.s32.totalorder %s1178_s16, %s877_s29  ;;  %p884_p5 = scmp.lt.u32.totalorder %s882_s17, %s877_s29 }
  0x25   : > { %p886_p7 = scmp.lt.u32.totalorder %s877_s29, %s1178_s16 }
  0x26   : > { %p880_p2 = pnand %p1191_p1, %p878_p0  ;;  %p885_p6 = por %p884_p5, %p883_p4 }
  0x28   : > { %p881_p3 = pneg %p880_p2  ;;  %p887_p10 = por %p886_p7, %p885_p6 }
  0x2a   : > { %p888_p12 = pnand %p887_p10, %p881_p3 }
  0x2c   : > { %891 = shalt.err (!%p888_p12)
}
  0x2d   : > { %s892_s13 = scalar_lea.vmem %s1183_s25, 128  ;;  %s1055_s14 = smov [#allocation5]  }
  0x2e   : > { %p893_p0 = scmp.ne.s32.totalorder %s1183_s25, %s892_s13  ;;  %s897_s15 = sshll.u32 %s1055_s14, 4  ;;  %s898_s15 = int_to_ptr.vmem [resolvable:$false] %s897_s15 }
  0x2f   : > { %s899_s10 = scalar_lea.vmem %s898_s15, 256  ;;  %p900_p9 = scmp.lt.s32.totalorder %s1183_s25, %s898_s15 }
  0x30   : > { %p895_p2 = pnand %p893_p0, %p1191_p1  ;;  %p901_p8 = scmp.lt.s32.totalorder %s899_s10, %s892_s13 }
  0x32   : > { %p896_p11 = pneg %p895_p2  ;;  %p902_p4 = por %p901_p8, %p900_p9 }
  0x34   : > { %p903_p5 = pnand %p902_p4, %p896_p11 }
  0x36   : > { %906 = shalt.err (!%p903_p5)
}
  0x37   : > { %814 = dma.hbm_to_vmem [thread:$0]  (!%p1168_p13), %s1178_s16, 128, %s1183_s25, %s1185_s28  }
  0x38   : > { %s261_s11 = scalar_lea.vmem [#allocation7], %s701_s27  ;;  %p704_p8 = scmp.ge.s32.totalorder %s1053_s23, 1 }
  0x39   : > { %s268_s29 = sshll.u32 %s261_s11, 4  ;;  %p282_p9 = scmp.lt.s32.totalorder %s1053_s23, 4  ;;  %s1218_s29 = int_to_ptr.vmem [resolvable:$true] %s268_s29 }
  0x3a   : > { %s1414_s13 = sshll.u32 %s1049_s22, 7  ;;  %s1415_s1 = sshll.u32 %s1162_s9, 3 }
  0x3b   : > { %p1221_p11 = pnand %p704_p8, %p282_p9  ;;  %s1230_s10 = scalar_lea.hbm %s1386_s0, %s1414_s13 }
  0x3c   : > { %s218_s16 = scalar_lea.vmem [#allocation2], %s1415_s1  ;;  %s716_s27 = sshll.u32 %s1049_s22, 11 }
  0x3d   : > { %s1413_s17 = scalar_select %p1221_p11, 1, 0 }
  0x3e   : > { %s226_s25 = sshll.u32 %s218_s16, 4  ;;  %s1240_s20 = scalar_lea.hbm %s1389_s3, %s716_s27  ;;  %s1235_s25 = int_to_ptr.vmem [resolvable:$true] %s226_s25 }
  0x3f   : > { %s215_s8 = scalar_lea.sflag [#allocation3], %s1162_s9  ;;  %s907_s18 = scalar_lea.hbm %s1230_s10, 128 }
  0x40   : > { %p908_p3 = scmp.ne.s32.totalorder %s1230_s10, %s907_s18  ;;  %s912_s15 = scalar_lea.hbm %s1386_s0, 384 }
  0x41   : > { %p913_p10 = scmp.lt.u32.totalorder %s1230_s10, %s1386_s0  ;;  %p914_p12 = scmp.lt.u32.totalorder %s912_s15, %s907_s18 }
  0x42   : > { %p910_p6 = pnand %p908_p3, %p1191_p1  ;;  %p916_p2 = scmp.lt.u32.totalorder %s907_s18, %s1230_s10 }
  0x43   : > { %p915_p0 = por %p914_p12, %p913_p10 }
  0x44   : > { %p911_p7 = pneg %p910_p6 }
  0x45   : > { %p917_p4 = por %p916_p2, %p915_p0 }
  0x47   : > { %p918_p5 = pnand %p917_p4, %p911_p7 }
  0x49   : > { %921 = shalt.err (!%p918_p5)
}
  0x4a   : > { %s922_s7 = scalar_lea.vmem %s1235_s25, 128  ;;  %s1056_s9 = smov [#allocation2]  }
  0x4b   : > { %p923_p8 = scmp.ne.s32.totalorder %s1235_s25, %s922_s7  ;;  %s927_s27 = sshll.u32 %s1056_s9, 4  ;;  %s928_s27 = int_to_ptr.vmem [resolvable:$false] %s927_s27 }
  0x4c   : > { %s929_s11 = scalar_lea.vmem %s928_s27, 256  ;;  %p930_p6 = scmp.lt.s32.totalorder %s1235_s25, %s928_s27 }
  0x4d   : > { %p925_p9 = pnand %p923_p8, %p1191_p1  ;;  %p931_p11 = scmp.lt.s32.totalorder %s929_s11, %s922_s7 }
  0x4f   : > { %p926_p3 = pneg %p925_p9  ;;  %p932_p10 = por %p931_p11, %p930_p6 }
  0x51   : > { %p933_p12 = pnand %p932_p10, %p926_p3 }
  0x53   : > { %936 = shalt.err (!%p933_p12)
}
  0x54   : > { %811 = dma.hbm_to_vmem [thread:$0]  (!%p1168_p13), %s1230_s10, 128, %s1235_s25, %s215_s8  }
  0x55   : > { %s937_s18 = scalar_lea.hbm %s1240_s20, 2048  ;;  %s942_s15 = scalar_lea.hbm %s1389_s3, 6144 }
  0x56   : > { %p938_p7 = scmp.ne.s32.totalorder %s1240_s20, %s937_s18  ;;  %p943_p11 = scmp.lt.u32.totalorder %s1240_s20, %s1389_s3 }
  0x57   : > { %p944_p4 = scmp.lt.u32.totalorder %s942_s15, %s937_s18  ;;  %p946_p8 = scmp.lt.u32.totalorder %s937_s18, %s1240_s20 }
  0x58   : > { %p940_p0 = pnand %p938_p7, %p1191_p1 }
  0x59   : > { %p945_p5 = por %p944_p4, %p943_p11 }
  0x5a   : > { %p941_p2 = pneg %p940_p0 }
  0x5b   : > { %p947_p9 = por %p946_p8, %p945_p5 }
  0x5d   : > { %p948_p3 = pnand %p947_p9, %p941_p2 }
  0x5f   : > { %951 = shalt.err (!%p948_p3)
}
  0x60   : > { %s952_s8 = scalar_lea.vmem %s1218_s29, 2048  ;;  %s1057_s10 = smov [#allocation7]  }
  0x61   : > { %p953_p6 = scmp.ne.s32.totalorder %s1218_s29, %s952_s8  ;;  %s957_s25 = sshll.u32 %s1057_s10, 4  ;;  %s958_s25 = int_to_ptr.vmem [resolvable:$false] %s957_s25 }
  0x62   : > { %s959_s7 = scalar_lea.vmem %s958_s25, 4096  ;;  %p960_p7 = scmp.lt.s32.totalorder %s1218_s29, %s958_s25 }
  0x63   : > { %p955_p10 = pnand %p953_p6, %p1191_p1  ;;  %p961_p0 = scmp.lt.s32.totalorder %s959_s7, %s952_s8 }
  0x65   : > { %p956_p12 = pneg %p955_p10  ;;  %p962_p11 = por %p961_p0, %p960_p7 }
  0x67   : > { %p963_p4 = pnand %p962_p11, %p956_p12 }
  0x69   : > { %966 = shalt.err (!%p963_p4)
}
  0x6a   : > { %s1058_s9 = smov 128   ;;  %s1059_s27 = smov 8  }
  0x6b   : > { %817 = dma.hbm_to_vmem [thread:$0]  (!%p1168_p13), %s1240_s20, 2048, %s1218_s29, %s1185_s28, %s1058_s9, %s1058_s9, %s1059_s27  }
  0x6c   : > { %p1416_p1 = scmp.ne.s32.totalorder %s1413_s17, 0 }
  0x6d   : > { %s1289_s26 = sand.u32 (!%p1416_p1), 1, %s1037_s19   ;;  %p1417_p2 = scmp.ne.s32.totalorder (!%p1416_p1), %s1405_s30, 0 }
  0x6e   : > { %286 = sbr.rel (%p1416_p1) target bundleno = 569 (0x239), region = 40  ;;  %s1292_s11 = sshll.u32 (!%p1416_p1), %s1289_s26, 3 }
  0x6f   : > { %s289_s18 = scalar_lea.sflag (!%p1416_p1), [#allocation3], %s1289_s26  ;;  %s292_s13 = scalar_lea.vmem (!%p1416_p1), [#allocation2], %s1292_s11 }
  0x75   : > { %1020 = dma.done.wait (%p1417_p2), %s289_s18, 128  }
  0x76   : > { %1022 = vsyncadd (%p1417_p2), %s289_s18, 4294967168  ;;  %s297_s20 = sand.u32 1, %s1125_s24   ;;  %s301_s28 = scalar_lea.vmem [#allocation5], %s1292_s11 }
  0x77   : > { %s298_s12 = scalar_lea.sflag [#allocation6], %s297_s20 }
  0x78   : > { %1024 = dma.done.wait (%p1417_p2), %s298_s12, 2176  }
  0x79   : > { %1026 = vsyncadd (%p1417_p2), %s298_s12, 4294965120  ;;  %v1060_v0 = vmov 0.0   ;;  %vm1061_vm0 = vmmov 0   ;;  %s707_s29 = sshll.u32 %s1289_s26, 7  ;;  %v1062_v1 = vmov 0.0|0.0   ;;  %vm368_vm1 = vcmask 64512  }
  0x7a   : > { %736 = vmatprep.subr.mxu0 %v1060_v0  ;;  %738 = vmatprep.mubr.msk.f32.mxu0 %vm1061_vm0, %v1060_v0  ;;  %v360_v2 = vld [vmem:[%s301_s28] sm:$0xff]  ;;  %v359_v3 = vld [vmem:[%s292_s13] sm:$0xff]  ;;  %s1307_s24 = scalar_lea.vmem [#allocation7], %s707_s29  ;;  %p353_p13 = scmp.lt.s32.totalorder %s1045_s21, 2 }
  0x7b   : > { %776 = vmatprep.subr.bf16.mxu1 %v1062_v1  ;;  %773 = vmatprep.mubr.msk.f32.mxu1 %vm1061_vm0, %v1060_v0  ;;  %v443_v4 = vld [vmem:[%s1307_s24] sm:$0xff]  ;;  %v444_v5 = vld [vmem:[%s1307_s24 + $0x8] sm:$0xff]  ;;  %v445_v6 = vld [vmem:[%s1307_s24 + $0x10] sm:$0xff]  ;;  %s713_s10 = sshll.u32 %s1045_s21, 7  ;;  %s352_s25 = scalar_lea.vmem [#allocation8], %s1292_s11 }
  0x7c   : > { %737 = vmatpush3.msra.mxu0 %v360_v2  ;;  %v446_v7 = vld [vmem:[%s1307_s24 + $0x18] sm:$0xff]  ;;  %v777_v8 = vpack.c.bf16 %v444_v5, %v443_v4  ;;  %v447_v10 = vld [vmem:[%s1307_s24 + $0x20] sm:$0xff]  ;;  %v448_v11 = vld [vmem:[%s1307_s24 + $0x28] sm:$0xff]  ;;  %s354_s30 = scalar_select %p353_p13, %s1045_s21, 2 }
  0x7d   : > { %739 = vmatmul.mubr.msk.f32.vlgmr.msra.gmra.mrb[0].mxu0 %vm368_vm1, %v359_v3  ;;  %v780_v9 = vpack.c.bf16 %v446_v7, %v445_v6  ;;  %v783_v12 = vpack.c.bf16 %v448_v11, %v447_v10  ;;  %v449_v13 = vld [vmem:[%s1307_s24 + $0x30] sm:$0xff]  ;;  %v450_v14 = vld [vmem:[%s1307_s24 + $0x38] sm:$0xff]  ;;  %v451_v16 = vld [vmem:[%s1307_s24 + $0x40] sm:$0xff]  ;;  %s552_s7 = sshll.u32 %s352_s25, 4  ;;  %s1338_s18 = scalar_lea.hbm %s1391_s5, %s713_s10  ;;  %s1340_s7 = int_to_ptr.vmem [resolvable:$true] %s552_s7 }
  0x7e   : > { %778 = vmatpush3.bf16.msra.mxu1 %v777_v8  ;;  %v786_v15 = vpack.c.bf16 %v450_v14, %v449_v13  ;;  %v452_v17 = vld [vmem:[%s1307_s24 + $0x48] sm:$0xff]  ;;  %v453_v19 = vld [vmem:[%s1307_s24 + $0x50] sm:$0xff]  ;;  %v454_v20 = vld [vmem:[%s1307_s24 + $0x58] sm:$0xff]  ;;  %s355_s15 = scalar_lea.vmem %s1388_s2, %s354_s30  ;;  %s358_s8 = scalar_lea.vmem %s1390_s4, %s354_s30 }
  0x7f   : > { %779 = vmatprep.subr.bf16.mxu1 %v1062_v1  ;;  %v789_v18 = vpack.c.bf16 %v452_v17, %v451_v16  ;;  %v792_v21 = vpack.c.bf16 %v454_v20, %v453_v19  ;;  %v455_v22 = vld [vmem:[%s1307_s24 + $0x60] sm:$0xff]  ;;  %v456_v23 = vld [vmem:[%s1307_s24 + $0x68] sm:$0xff]  ;;  %v457_v25 = vld [vmem:[%s1307_s24 + $0x70] sm:$0xff]  ;;  %s538_s13 = scalar_lea.sflag [#allocation4], %s1289_s26  ;;  %s967_s20 = scalar_lea.vmem %s1340_s7, 128 }
  0x80   : > { %v795_v24 = vpack.c.bf16 %v456_v23, %v455_v22  ;;  %v458_v26 = vld [vmem:[%s1307_s24 + $0x78] sm:$0xff]  ;;  %v709_v28 = vld [vmem:[%s355_s15] ss:$0 sm:$0xff]  ;;  %p968_p5 = scmp.ne.s32.totalorder %s1340_s7, %s967_s20  ;;  %p1418_p8 = scmp.ne.s32.totalorder %s1406_s6, 0 }
  0x81   : > { %v798_v27 = vpack.c.bf16 %v458_v26, %v457_v25  ;;  %v711_v33 = vld [vmem:[%s358_s8] ss:$0 sm:$0xff]  ;;  %s1063_s21 = smov [#allocation8]  }
  0x82   : > { %781 = vmatpush3.bf16.msra.mxu1 %v780_v9  ;;  %p969_p9 = pnand %p968_p5, %p1418_p8  ;;  %s971_s11 = sshll.u32 %s1063_s21, 4  ;;  %s972_s11 = int_to_ptr.vmem [resolvable:$false] %s971_s11 }
  0x83   : > { %782 = vmatprep.subr.bf16.mxu1 %v1062_v1  ;;  %s973_s12 = scalar_lea.vmem %s972_s11, 256  ;;  %p974_p6 = scmp.lt.s32.totalorder %s1340_s7, %s972_s11 }
  0x84   : > { %p970_p3 = pneg %p969_p9  ;;  %p975_p10 = scmp.lt.s32.totalorder %s973_s12, %s967_s20 }
  0x86   : > { %784 = vmatpush3.bf16.msra.mxu1 %v783_v12  ;;  %p976_p12 = por %p975_p10, %p974_p6 }
  0x87   : > { %785 = vmatprep.subr.bf16.mxu1 %v1062_v1 }
  0x88   : > { %p977_p7 = pnand %p976_p12, %p970_p3 }
  0x8a   : > { %787 = vmatpush3.bf16.msra.mxu1 %v786_v15 }
  0x8b   : > { %788 = vmatprep.subr.bf16.mxu1 %v1062_v1 }
  0x8e   : > { %790 = vmatpush3.bf16.msra.mxu1 %v789_v18 }
  0x8f   : > { %791 = vmatprep.subr.bf16.mxu1 %v1062_v1 }
  0x92   : > { %793 = vmatpush3.bf16.msra.mxu1 %v792_v21 }
  0x93   : > { %794 = vmatprep.subr.bf16.mxu1 %v1062_v1 }
  0x96   : > { %796 = vmatpush3.bf16.msra.mxu1 %v795_v24 }
  0x97   : > { %797 = vmatprep.subr.bf16.mxu1 %v1062_v1 }
  0x9a   : > { %799 = vmatpush3.bf16.msra.mxu1 %v798_v27 }
 0x150   : > { %v438_v29 = vpop.f32.mrb[0].mxu0 }
 0x151   : > { %v439_v30 = vadd.f32 %v709_v28, %v438_v29  ;;  %v740_v31 = vpop.f32.mrb[1].mxu0 }
 0x153   : > { %v442_v32 = vmax.f32 %v439_v30, 0.0 }
 0x155   : > { %774 = vmatmul.mubr.f32.vlgmr.msra.gmra.mrb[0].mxu1 %v442_v32 }
 0x228   : > { %v532_v34 = vpop.f32.mrb[0].mxu1 }
 0x229   : > { %v533_v35 = vadd.f32 %v711_v33, %v532_v34  ;;  %v775_v36 = vpop.f32.mrb[1].mxu1 }
 0x22b   : > { %536 = vst [vmem:[%s352_s25] sm:$0xff] %v533_v35 }
 0x22c   : > { %980 = shalt.err (!%p977_p7)
}
 0x22d   : > { %s981_s26 = scalar_lea.hbm %s1338_s18, 128  ;;  %s985_s24 = scalar_lea.hbm %s1391_s5, 384 }
 0x22e   : > { %p982_p0 = scmp.ne.s32.totalorder %s1338_s18, %s981_s26  ;;  %p986_p1 = scmp.lt.u32.totalorder %s1338_s18, %s1391_s5 }
 0x22f   : > { %p987_p2 = scmp.lt.u32.totalorder %s985_s24, %s981_s26  ;;  %p989_p5 = scmp.lt.u32.totalorder %s981_s26, %s1338_s18 }
 0x230   : > { %p983_p11 = pnand %p982_p0, %p1418_p8 }
 0x231   : > { %p988_p13 = por %p987_p2, %p986_p1 }
 0x232   : > { %p984_p4 = pneg %p983_p11 }
 0x233   : > { %p990_p9 = por %p989_p5, %p988_p13 }
 0x235   : > { %p991_p3 = pnand %p990_p9, %p984_p4 }
 0x237   : > { %994 = shalt.err (!%p991_p3)
}
 0x238   : > { %806 = dma.vmem_to_hbm [thread:$0]  (%p1418_p8), %s1340_s7, 128, %s1338_s18, %s538_s13  }
 0x239 PF: > { %s1419_s14 = sld [smem:[#allocation12_spill]]  ;;  %s1420_s15 = sld [smem:[#allocation16_spill]] }
 0x23a   : > { %p823_p6 = scmp.ge.s32.totalorder %s1053_s23, 2 }
 0x23f   : > { %s564_s1 = sand.u32 1, %s1419_s14   ;;  %p1421_p10 = scmp.ne.s32.totalorder %s1420_s15, 0 }
 0x240   : > { %s565_s16 = scalar_lea.sflag [#allocation4], %s564_s1 }
 0x241   : > { %p819_p12 = pnand %p823_p6, %p1421_p10 }
 0x243   : > { %1028 = dma.done.wait (!%p819_p12), %s565_s16, 128  }
 0x244   : > { %1030 = vsyncadd (!%p819_p12), %s565_s16, 4294967168  ;;  %s24_s23 = sadd.s32 1, %s1053_s23   ;;  %s1422_s8 = sld [smem:[#allocation13_spill]] }
 0x245   : > { %p21_p7 = scmp.ge.s32.totalorder %s24_s23, 5   ;;  %s1423_s20 = sld [smem:[#allocation15_spill]] }
 0x246   : > { %s1424_s6 = sld [smem:[#allocation14_spill]]  ;;  %s1425_s18 = smov %s1037_s19 }
 0x247   : > { %s1427_s21 = smov %s1049_s22  ;;  %23 = sbr.rel (!%p21_p7) target bundleno = 10 (0xa), region = 115 }
 0x24a   : > { %s1426_s19 = smov %s1422_s8 }
 0x24c   : > { %s1428_s22 = smov %s1424_s6 }
 0x24e   :  { %570 = vsyncpa [#allocation3], 1 }
 0x24f   :  { %572 = vsyncpa [#allocation3 + $0x1], 1 }
 0x250   :  { %573 = vsyncpa [#allocation6], 1 }
 0x251   :  { %575 = vsyncpa [#allocation6 + $0x1], 1 }
 0x252   :  { %576 = vsyncpa [#allocation4], 1 }
 0x253   :  { %578 = vsyncpa [#allocation4 + $0x1], 1 }

</bundles_post_ra>
